<compile_context>
chip_gen: v6e
topology: v6e:2x2x1
jax: 0.10.0
libtpu: 0.0.40
codegen_flags: <defaults>
</compile_context>

<pallas_src>
import jax
import jax.numpy as jnp
from jax.experimental import pallas as pl
from jax.experimental.pallas import tpu as pltpu

K_SOFT = 25.0
V_OUT_MAX = 1.1


def _round_up(x, m):
    return ((x + m - 1) // m) * m


def quantize_weights(w):
    """q4 forward value of the weights, padded on the class dim to a multiple
    of 128 (lane-dense output stores) and stored as bf16 (integers in [-8, 7]
    are exact in bf16 -> lossless, half the HBM weight traffic).

    Pure function of the (static) parameters: call ONCE per weight update, not
    per forward.
    """
    C, F = w.shape
    wq = jnp.clip(jnp.round(w), -8.0, 7.0).astype(jnp.bfloat16)
    C_pad = _round_up(C, 128)
    if C_pad != C:
        wq = jnp.pad(wq, ((0, C_pad - C), (0, 0)))
    return wq


def output_layer_kernel(h_ref, w_ref, o_ref):
    # bf16 x bf16 on the MXU with f32 accumulation.  Contract over the last
    # dim of BOTH operands -> weights feed the MXU in native (C, F) layout,
    # no transpose and no widened temporary in VMEM.
    vdiff = jax.lax.dot_general(
        h_ref[...], w_ref[...],
        dimension_numbers=(((1,), (1,)), ((), ())),
        preferred_element_type=jnp.float32)                    # (TILE_B, TILE_C)
    # soft_cs epilogue: sigmoid's exp/recip go to the (otherwise idle) EUP.
    o_ref[...] = (V_OUT_MAX * jax.nn.sigmoid(K_SOFT * vdiff)).astype(o_ref.dtype)


def output_layer(h, wq, classes=None, *, tile_b=512, tile_c=512,
                 compute_dtype=jnp.bfloat16,
                 vmem_limit_bytes=48 * 1024 * 1024):
    """h: (B, in_feats) f32, wq: (C_pad, in_feats) pre-quantized (see
    quantize_weights), C_pad a multiple of 128.  Returns (B, classes) f32.

    compute_dtype=jnp.float32 gives a bit-exact (but slower) path if needed.
    """
    B, F = h.shape
    C_pad, F2 = wq.shape
    assert F == F2
    assert C_pad % 128 == 0, "quantize_weights() pads classes to a multiple of 128"
    if classes is None:
        classes = C_pad

    h = h.astype(compute_dtype)
    if wq.dtype != compute_dtype:
        wq = wq.astype(compute_dtype)

    # Tile sizes: B tiles are multiples of 8 (sublanes), C tiles are multiples
    # of 128 (lane-dense stores) and must divide the pre-padded C_pad.
    tb = max(8, min(tile_b, _round_up(B, 8)))
    B_pad = _round_up(B, tb)
    tc = max(128, min(tile_c, C_pad))
    tc -= tc % 128
    while C_pad % tc:
        tc -= 128

    if B_pad != B:
        h = jnp.pad(h, ((0, B_pad - B), (0, 0)))

    # Grid: weights on the OUTER axis (constant across the inner B loop ->
    # the C x F weight matrix streams through HBM exactly once), activations
    # and outputs on the inner axis.  On v7x, megacore sharding of the
    # "parallel" axes splits the grid across the two TensorCores when the
    # grid has >= 2 tiles.
    grid = (C_pad // tc, B_pad // tb)

    out_padded = pl.pallas_call(
        output_layer_kernel,
        out_shape=jax.ShapeDtypeStruct((B_pad, C_pad), jnp.float32),
        grid_spec=pltpu.PrefetchScalarGridSpec(
            num_scalar_prefetch=0,
            grid=grid,
            in_specs=[
                pl.BlockSpec((tb, F), lambda ci, bi: (bi, 0)),  # h tile (inner axis)
                pl.BlockSpec((tc, F), lambda ci, bi: (ci, 0)),  # wq tile (outer axis, resident)
            ],
            out_specs=pl.BlockSpec((tb, tc), lambda ci, bi: (bi, ci)),
        ),
        compiler_params=pltpu.CompilerParams(
            dimension_semantics=("parallel", "parallel"),
            vmem_limit_bytes=vmem_limit_bytes),
    )(h, wq)

    return out_padded[:B, :classes]


def output_layer_ref(h, w):
    """Pure-JAX f32 reference (forward value of the PyTorch module)."""
    wq = jnp.clip(jnp.round(w), -8.0, 7.0)
    return V_OUT_MAX * jax.nn.sigmoid(K_SOFT * (h @ wq.T))


if __name__ == "__main__":
    key = jax.random.PRNGKey(0)
    k_h, k_w = jax.random.split(key)

    B, IN_FEATS, CLASSES = 4, 28, 10

    # Deterministic "parameters": uniform(-4, 4) as in nn.init.uniform_(self.w, -4, 4)
    w = jax.random.uniform(k_w, (CLASSES, IN_FEATS), jnp.float32, minval=-4.0, maxval=4.0)
    # Example input features
    h = jax.random.normal(k_h, (B, IN_FEATS), jnp.float32)

    # Quantize/pad the weights once (outside the per-forward hot path).
    wq = quantize_weights(w)

    out = output_layer(h, wq, CLASSES)
    out = jax.block_until_ready(out)
    assert out.shape == (B, CLASSES)

    # --- correctness checks ---
    wq_f32 = jnp.clip(jnp.round(w), -8.0, 7.0)
    h_bf16 = h.astype(jnp.bfloat16).astype(jnp.float32)

    # 1) Tight check of the kernel math: same computation with bf16-rounded h
    #    (bf16 x bf16 products are exact in the f32 MXU accumulator).
    ref_match = V_OUT_MAX * jax.nn.sigmoid(K_SOFT * (h_bf16 @ wq_f32.T))
    assert jnp.allclose(out, ref_match, atol=2e-3, rtol=2e-3), "mismatch vs bf16-activation reference"

    # 2) Check against the f32 module reference with a rigorous data-dependent
    #    bound on the error introduced by casting h to bf16:
    #    |d out / d vdiff| <= V_OUT_MAX * K_SOFT / 4,  |d vdiff| <= |h - h_bf16| @ |wq|^T.
    ref_f32 = output_layer_ref(h, w)
    vdiff_err = jnp.abs(h - h_bf16) @ jnp.abs(wq_f32).T
    bound = (V_OUT_MAX * K_SOFT * 0.25) * vdiff_err + 1e-3
    assert jnp.all(jnp.abs(out - ref_f32) <= bound), "exceeds bf16 error bound vs f32 reference"

    print("KERNEL_OK")
</pallas_src>

<mosaic_0001>
module attributes {stable_mosaic.version = 11 : i64} {
  func.func @output_layer_kernel(%arg0: i32, %arg1: i32, %arg2: memref<8x28xbf16, #tpu.memory_space<vmem>>, %arg3: memref<128x28xbf16, #tpu.memory_space<vmem>>, %arg4: memref<8x128xf32, #tpu.memory_space<vmem>>) attributes {dimension_semantics = [#tpu.dimension_semantics<parallel>, #tpu.dimension_semantics<parallel>], iteration_bounds = array<i64: 1, 1>, scalar_prefetch = 0 : i64, scratch_operands = 0 : i64, tpu.core_type = #tpu.core_type<tc>, window_params = [{transform_indices = @transform_0, window_bounds = array<i64: 8, 28>}, {transform_indices = @transform_1, window_bounds = array<i64: 128, 28>}, {transform_indices = @transform_2, window_bounds = array<i64: 8, 128>}]} {
    %c0 = arith.constant 0 : index
    %c0_0 = arith.constant 0 : index
    %0 = vector.load %arg2[%c0, %c0_0] : memref<8x28xbf16, #tpu.memory_space<vmem>>, vector<8x28xbf16>
    %c0_1 = arith.constant 0 : index
    %c0_2 = arith.constant 0 : index
    %1 = vector.load %arg3[%c0_1, %c0_2] : memref<128x28xbf16, #tpu.memory_space<vmem>>, vector<128x28xbf16>
    %cst = arith.constant dense<0.000000e+00> : vector<8x128xf32>
    %2 = tpu.matmul %0, %1, %cst {dimension_numbers = #tpu.dot_dimension_numbers<[1], [1], [0], [0], [0, 0, 1, 0], [], []>} : vector<8x28xbf16>, vector<128x28xbf16>, vector<8x128xf32> -> vector<8x128xf32>
    %cst_3 = arith.constant 2.500000e+01 : f32
    %3 = vector.broadcast %cst_3 : f32 to vector<8x128xf32>
    %4 = arith.mulf %3, %2 : vector<8x128xf32>
    %5 = arith.negf %4 : vector<8x128xf32>
    %6 = math.exp %5 : vector<8x128xf32>
    %cst_4 = arith.constant 1.000000e+00 : f32
    %7 = vector.broadcast %cst_4 : f32 to vector<8x128xf32>
    %8 = arith.addf %7, %6 : vector<8x128xf32>
    %9 = arith.divf %7, %8 : vector<8x128xf32>
    %cst_5 = arith.constant 1.100000e+00 : f32
    %10 = vector.broadcast %cst_5 : f32 to vector<8x128xf32>
    %11 = arith.mulf %10, %9 : vector<8x128xf32>
    %c0_6 = arith.constant 0 : index
    %c0_7 = arith.constant 0 : index
    %12 = vector.load %arg4[%c0_6, %c0_7] : memref<8x128xf32, #tpu.memory_space<vmem>>, vector<8x128xf32>
    tpu.vector_store %arg4[%c0_6, %c0_7], %11 {strides = array<i32>} : memref<8x128xf32, #tpu.memory_space<vmem>>, vector<8x128xf32>,
    return
  }
  func.func @transform_0(%arg0: i32, %arg1: i32) -> (i32, i32) {
    %c0_i32 = arith.constant 0 : i32
    %c0_i32_0 = arith.constant 0 : i32
    return %arg1, %c0_i32 : i32, i32
  }
  func.func @transform_1(%arg0: i32, %arg1: i32) -> (i32, i32) {
    %c0_i32 = arith.constant 0 : i32
    %c0_i32_0 = arith.constant 0 : i32
    return %arg0, %c0_i32 : i32, i32
  }
  func.func @transform_2(%arg0: i32, %arg1: i32) -> (i32, i32) {
    %c0_i32 = arith.constant 0 : i32
    return %arg1, %arg0 : i32, i32
  }
}

</mosaic_0001>

<bundles_post_ra>
// kernel: tpu_custom_call.1
= control target key start
LH: loop header
LB: loop body
LE: loop exit
PB: predicated region body
PF: predicated region fallthrough
CT: control target
= control target key end

     0   :  { %v237_v1 = vmov 0.0   ;;  %vm70_vm0 = vcmask 228352   ;;  %s294_s0 = inlined_call_operand.vmem [shape: bf16[8,28], index: 0, kind: input, shape index: {}]   ;;  %s295_s1 = inlined_call_operand.vmem [shape: bf16[128,28], index: 1, kind: input, shape index: {}]   ;;  %s296_s2 = inlined_call_operand.hbm [shape: f32[8,128], index: 2, kind: output, shape index: {}]  }
   0x1   :  { %v203_v0 = vld [vmem:[%s295_s1 + $0x38] sm:$0xff]   ;;  %180 = vmatprep.subr.bf16.mxu0 %v237_v1  ;;  %v204_v3 = vld [vmem:[%s295_s1 + $0x30] sm:$0xff]  }
   0x2   :  { %v96_v2 = vsel %vm70_vm0, %v203_v0, 0  ;;  %v93_v4 = vsel %vm70_vm0, %v204_v3, 0 }
   0x3   :  { %181 = vmatpush3.bf16.xpose.msra.mxu0 %v96_v2 }
   0x4   :  { %182 = vmatprep.subr.bf16.mxu0 %v237_v1 }
   0x5   :  { %7 = vsyncpa [#allocation3], 0  ;;  %vm238_vm1 = vmmov 0   ;;  %v205_v5 = vld [vmem:[%s295_s1 + $0x28] sm:$0xff]   ;;  %v206_v7 = vld [vmem:[%s295_s1 + $0x20] sm:$0xff]  }
   0x6   :  { %196 = vmatprep.mubr.msk.bf16.mxu0 %vm238_vm1, %v237_v1  ;;  %v90_v6 = vsel %vm70_vm0, %v205_v5, 0  ;;  %v87_v8 = vsel %vm70_vm0, %v206_v7, 0  ;;  %v207_v9 = vld [vmem:[%s295_s1 + $0x18] sm:$0xff]   ;;  %v208_v11 = vld [vmem:[%s295_s1 + $0x10] sm:$0xff]   ;;  %v209_v13 = vld [vmem:[%s295_s1 + $0x8] sm:$0xff]  }
   0x7   :  { %v84_v10 = vsel %vm70_vm0, %v207_v9, 0  ;;  %v81_v12 = vsel %vm70_vm0, %v208_v11, 0  ;;  %v78_v14 = vsel %vm70_vm0, %v209_v13, 0  ;;  %v210_v15 = vld [vmem:[%s295_s1] sm:$0xff]   ;;  %s239_s1 = smov [#allocation2]  }
   0x8   :  { %v75_v16 = vsel %vm70_vm0, %v210_v15, 0  ;;  %v13_v17 = vld [vmem:[%s294_s0] sm:$0xf]  ;;  %s153_s27 = sshll.u32 %s239_s1, 4  ;;  %s154_s27 = int_to_ptr.vmem [resolvable:$true] %s153_s27 }
   0x9   :  { %s215_s28 = scalar_lea.vmem %s154_s27, 128  ;;  %p220_p1 = scmp.lt.s32.totalorder %s154_s27, %s154_s27 }
   0xa   :  { %p216_p0 = scmp.ne.s32.totalorder %s154_s27, %s215_s28  ;;  %p221_p2 = scmp.lt.s32.totalorder %s215_s28, %s215_s28 }
   0xb   :  { %183 = vmatpush3.bf16.xpose.msra.mxu0 %v93_v4 }
   0xc   :  { %184 = vmatprep.subr.bf16.mxu0 %v237_v1  ;;  %p222_p3 = por %p221_p2, %p220_p1 }
   0xe   :  { %p223_p4 = pnand %p222_p3, %p216_p0 }
  0x13   :  { %185 = vmatpush3.bf16.xpose.msra.mxu0 %v90_v6 }
  0x14   :  { %186 = vmatprep.subr.bf16.mxu0 %v237_v1 }
  0x1b   :  { %187 = vmatpush3.bf16.xpose.msra.mxu0 %v87_v8 }
  0x1c   :  { %188 = vmatprep.subr.bf16.mxu0 %v237_v1 }
  0x23   :  { %189 = vmatpush3.bf16.xpose.msra.mxu0 %v84_v10 }
  0x24   :  { %190 = vmatprep.subr.bf16.mxu0 %v237_v1 }
  0x2b   :  { %191 = vmatpush3.bf16.xpose.msra.mxu0 %v81_v12 }
  0x2c   :  { %192 = vmatprep.subr.bf16.mxu0 %v237_v1 }
  0x33   :  { %193 = vmatpush3.bf16.xpose.msra.mxu0 %v78_v14 }
  0x34   :  { %194 = vmatprep.subr.bf16.mxu0 %v237_v1 }
  0x3b   :  { %195 = vmatpush3.bf16.xpose.msra.mxu0 %v75_v16 }
  0x42   :  { %197 = vmatmul.mubr.msk.bf16.vlgmr.msra.gmra.mxu0 %vm70_vm0, %v13_v17 }
 0x102   :  { %v132_v18 = vpop.f32.mrf.mxu0 }
 0x103   :  { %v170_v19 = vmul.f32 -25.0, %v132_v18 }
 0x104   :  { %v198_v20 = vpop.f32.mrf.mxu0 }
 0x105   :  { %v140_v21 = vmul.f32 1.442695, %v170_v19 }
 0x106   :  { %v135_v22 = vpop.f32.mrf.mxu0 }
 0x107   :  { %211 = vpow2.f32 %v140_v21 }
 0x108   :  { %v199_v23 = vpop.f32.mrf.mxu0 }
 0x114   :  { %v212_v24 = vpop.eup %211 }
 0x115   :  { %v142_v25 = vadd.f32 1.0, %v212_v24 }
 0x117   :  { %213 = vrcp.f32 %v142_v25 }
 0x124   :  { %v214_v26 = vpop.eup %213 }
 0x125   :  { %v145_v27 = vmul.f32 1.1, %v214_v26 }
 0x127   :  { %146 = vst [vmem:[#allocation2] sm:$0xff] %v145_v27 }
 0x128   :  { %226 = shalt.err (!%p223_p4)
}
 0x129   :  { %156 = dma.vmem_to_hbm [thread:$0]  %s154_s27, 128, %s296_s2, [#allocation3]  }
 0x12a   :  { %235 = dma.done.wait [#allocation3], 128  }
 0x12b   :  { %236 = vsyncadd [#allocation3], 4294967168 }
 0x12c   :  { %160 = vsyncpa [#allocation3], 1 }

</bundles_post_ra>
